<compile_context>
chip_gen: v7x
topology: tpu7x:2x2x1
jax: 0.10.0
libtpu: 0.0.40
codegen_flags: <defaults>
</compile_context>

<pallas_src>
from functools import partial

import jax
import jax.numpy as jnp
from jax.experimental import pallas as pl
from jax.experimental.pallas import tpu as pltpu


# ----------------------------------------------------------------------------
# Kernel
# ----------------------------------------------------------------------------
def encoder_kernel(b_true,
                   x_ref,
                   w1_ref, g1_ref, bt1_ref,
                   w2_ref, g2_ref, bt2_ref,
                   w3_ref, b3_ref,
                   out_ref):
    eps = jnp.float32(1e-5)
    inv_b = jnp.float32(1.0 / b_true)
    b_pad = x_ref.shape[0]
    padded_batch = b_pad != b_true  # static Python bool

    if padded_batch:
        row = jax.lax.broadcasted_iota(jnp.int32, (b_pad, 1), 0)
        valid_row = row < b_true

    def bn_relu(h, g, bt):
        # One-pass stats over the (possibly padded) batch. Padded rows are
        # exactly zero, so dividing by the true batch size gives full-batch
        # statistics (BatchNorm training-mode semantics, biased variance).
        s = jnp.sum(h, axis=0, keepdims=True)
        ss = jnp.sum(h * h, axis=0, keepdims=True)
        mean = s * inv_b
        var = jnp.maximum(ss * inv_b - mean * mean, 0.0)
        scale = g * jax.lax.rsqrt(var + eps)          # (1, F)
        shift = bt - mean * scale                     # (1, F)
        out = jnp.maximum(h * scale + shift, 0.0)     # fused mul+add + ReLU
        if padded_batch:
            out = jnp.where(valid_row, out, 0.0)      # keep padded rows zero
        return out

    x = x_ref[...]                                    # bf16, lane-dense

    # ---- Linear 1 (pre-BN bias dropped: cancelled by mean subtraction) ----
    h = jnp.dot(x, w1_ref[...], preferred_element_type=jnp.float32)
    h = bn_relu(h, g1_ref[...], bt1_ref[...])

    # ---- Linear 2 + BN + ReLU ----
    h = jnp.dot(h.astype(jnp.bfloat16), w2_ref[...],
                preferred_element_type=jnp.float32)
    h = bn_relu(h, g2_ref[...], bt2_ref[...])

    # ---- Linear 3 (latent projection, bias kept) ----
    z = jnp.dot(h.astype(jnp.bfloat16), w3_ref[...],
                preferred_element_type=jnp.float32)
    out_ref[...] = (z + b3_ref[...]).astype(out_ref.dtype)


# ----------------------------------------------------------------------------
# Wrapper: pad to lane/sublane-dense shapes, run kernel, slice back.
# ----------------------------------------------------------------------------
def _pad_axis(a, axis, multiple):
    pad = (-a.shape[axis]) % multiple
    if pad == 0:
        return a
    widths = [(0, 0)] * a.ndim
    widths[axis] = (0, pad)
    return jnp.pad(a, widths)


def encoder_forward(x, params):
    """x: (B, input_size) float32. params: dict (see init_params)."""
    B, D_in = x.shape
    n_hidden = params["w1"].shape[1]
    latent_dim = params["w3"].shape[1]

    # Pad shapes: batch -> multiple of 8 (sublanes), features -> multiple of
    # 128 (lanes). Zero padding is exact (see header comment).
    xp = _pad_axis(_pad_axis(x, 0, 8), 1, 128).astype(jnp.bfloat16)

    w1 = _pad_axis(_pad_axis(params["w1"], 0, 128), 1, 128).astype(jnp.bfloat16)
    g1 = _pad_axis(params["g1"], 1, 128)
    bt1 = _pad_axis(params["bt1"], 1, 128)

    w2 = _pad_axis(_pad_axis(params["w2"], 0, 128), 1, 128).astype(jnp.bfloat16)
    g2 = _pad_axis(params["g2"], 1, 128)
    bt2 = _pad_axis(params["bt2"], 1, 128)

    w3 = _pad_axis(_pad_axis(params["w3"], 0, 128), 1, 128).astype(jnp.bfloat16)
    b3 = _pad_axis(params["b3"], 1, 128)

    B_pad = xp.shape[0]
    L_pad = w3.shape[1]

    args = (xp, w1, g1, bt1, w2, g2, bt2, w3, b3)
    vmem_spec = pl.BlockSpec(memory_space=pltpu.MemorySpace.VMEM)

    out_padded = pl.pallas_call(
        partial(encoder_kernel, B),
        out_shape=jax.ShapeDtypeStruct((B_pad, L_pad), jnp.float32),
        in_specs=[vmem_spec] * len(args),
        out_specs=vmem_spec,
    )(*args)

    return out_padded[:B, :latent_dim]


# ----------------------------------------------------------------------------
# Parameter init (PyTorch nn.Linear-style uniform +-1/sqrt(fan_in))
# ----------------------------------------------------------------------------
def init_params(key, input_size, n_hidden, latent_dim):
    ks = jax.random.split(key, 6)

    def lin(kw, kb, fan_in, fan_out):
        bound = 1.0 / jnp.sqrt(jnp.float32(fan_in))
        w = jax.random.uniform(kw, (fan_in, fan_out), jnp.float32, -bound, bound)
        b = jax.random.uniform(kb, (1, fan_out), jnp.float32, -bound, bound)
        return w, b

    w1, b1 = lin(ks[0], ks[1], input_size, n_hidden)
    w2, b2 = lin(ks[2], ks[3], n_hidden, n_hidden)
    w3, b3 = lin(ks[4], ks[5], n_hidden, latent_dim)

    return {
        "w1": w1, "b1": b1,
        "g1": jnp.ones((1, n_hidden), jnp.float32),
        "bt1": jnp.zeros((1, n_hidden), jnp.float32),
        "w2": w2, "b2": b2,
        "g2": jnp.ones((1, n_hidden), jnp.float32),
        "bt2": jnp.zeros((1, n_hidden), jnp.float32),
        "w3": w3, "b3": b3,
    }


# ----------------------------------------------------------------------------
# References
# ----------------------------------------------------------------------------
def encoder_ref_mixed(x, p):
    """Same math / same mixed precision as the kernel (bf16 matmul operands,
    f32 accumulation and BN), including the pre-BN biases that the BN mean
    subtraction cancels."""
    eps = 1e-5

    def dot_bf16(a, b):
        return jnp.dot(a.astype(jnp.bfloat16), b.astype(jnp.bfloat16),
                       preferred_element_type=jnp.float32)

    def bn_relu(h, g, bt):
        m = jnp.mean(h, axis=0, keepdims=True)
        v = jnp.maximum(jnp.mean(h * h, axis=0, keepdims=True) - m * m, 0.0)
        return jnp.maximum(g * (h - m) * jax.lax.rsqrt(v + eps) + bt, 0.0)

    h = bn_relu(dot_bf16(x, p["w1"]) + p["b1"], p["g1"], p["bt1"])
    h = bn_relu(dot_bf16(h, p["w2"]) + p["b2"], p["g2"], p["bt2"])
    return dot_bf16(h, p["w3"]) + p["b3"]


def encoder_ref_f32(x, p):
    """Pure-f32 reference of the PyTorch forward (training-mode BN)."""
    eps = 1e-5

    def bn_relu(h, g, bt):
        m = jnp.mean(h, axis=0, keepdims=True)
        v = jnp.mean((h - m) ** 2, axis=0, keepdims=True)
        return jnp.maximum(g * (h - m) / jnp.sqrt(v + eps) + bt, 0.0)

    h = bn_relu(x @ p["w1"] + p["b1"], p["g1"], p["bt1"])
    h = bn_relu(h @ p["w2"] + p["b2"], p["g2"], p["bt2"])
    return h @ p["w3"] + p["b3"]


# ----------------------------------------------------------------------------
if __name__ == "__main__":
    # Module-default shapes: input_size = 28*28, latent_dim = 20, small hparams.
    batch, input_size, n_hidden, latent_dim = 8, 28 * 28, 128, 20

    key = jax.random.PRNGKey(0)
    kx, kp = jax.random.split(key)
    x = jax.random.normal(kx, (batch, input_size), jnp.float32)
    params = init_params(kp, input_size, n_hidden, latent_dim)

    out = encoder_forward(x, params)
    out = jax.block_until_ready(out)
    assert out.shape == (batch, latent_dim)

    # Tight check against a precision-matched (bf16 matmul) reference.
    ref_m = encoder_ref_mixed(x, params)
    assert jnp.allclose(out, ref_m, atol=5e-3, rtol=5e-3), "mismatch vs mixed ref"

    # Loose sanity check against the pure-f32 PyTorch-style forward.
    ref_f = encoder_ref_f32(x, params)
    assert jnp.allclose(out, ref_f, atol=1e-1, rtol=1e-1), "mismatch vs f32 ref"

    print("KERNEL_OK")
</pallas_src>

<mosaic_0001>
module attributes {stable_mosaic.version = 11 : i64} {
  func.func @encoder_kernel(%arg0: memref<8x896xbf16, #tpu.memory_space<vmem>>, %arg1: memref<896x128xbf16, #tpu.memory_space<vmem>>, %arg2: memref<1x128xf32, #tpu.memory_space<vmem>>, %arg3: memref<1x128xf32, #tpu.memory_space<vmem>>, %arg4: memref<128x128xbf16, #tpu.memory_space<vmem>>, %arg5: memref<1x128xf32, #tpu.memory_space<vmem>>, %arg6: memref<1x128xf32, #tpu.memory_space<vmem>>, %arg7: memref<128x128xbf16, #tpu.memory_space<vmem>>, %arg8: memref<1x128xf32, #tpu.memory_space<vmem>>, %arg9: memref<8x128xf32, #tpu.memory_space<vmem>>) attributes {dimension_semantics = [], scalar_prefetch = 0 : i64, scratch_operands = 0 : i64, tpu.core_type = #tpu.core_type<tc>} {
    %c0 = arith.constant 0 : index
    %c0_0 = arith.constant 0 : index
    %0 = vector.load %arg0[%c0, %c0_0] : memref<8x896xbf16, #tpu.memory_space<vmem>>, vector<8x896xbf16>
    %c0_1 = arith.constant 0 : index
    %c0_2 = arith.constant 0 : index
    %1 = vector.load %arg1[%c0_1, %c0_2] : memref<896x128xbf16, #tpu.memory_space<vmem>>, vector<896x128xbf16>
    %cst = arith.constant dense<0.000000e+00> : vector<8x128xf32>
    %2 = tpu.matmul %0, %1, %cst {dimension_numbers = #tpu.dot_dimension_numbers<[1], [0], [0], [1], [0, 0, 1, 1], [], []>} : vector<8x896xbf16>, vector<896x128xbf16>, vector<8x128xf32> -> vector<8x128xf32>
    %c0_3 = arith.constant 0 : index
    %c0_4 = arith.constant 0 : index
    %3 = vector.load %arg2[%c0_3, %c0_4] : memref<1x128xf32, #tpu.memory_space<vmem>>, vector<1x128xf32>
    %c0_5 = arith.constant 0 : index
    %c0_6 = arith.constant 0 : index
    %4 = vector.load %arg3[%c0_5, %c0_6] : memref<1x128xf32, #tpu.memory_space<vmem>>, vector<1x128xf32>
    %cst_7 = arith.constant dense<0.000000e+00> : vector<128xf32>
    %5 = vector.multi_reduction <add>, %2, %cst_7 [0] : vector<8x128xf32> to vector<128xf32>
    %6 = vector.shape_cast %5 : vector<128xf32> to vector<1x128xf32>
    %7 = arith.mulf %2, %2 : vector<8x128xf32>
    %cst_8 = arith.constant dense<0.000000e+00> : vector<128xf32>
    %8 = vector.multi_reduction <add>, %7, %cst_8 [0] : vector<8x128xf32> to vector<128xf32>
    %9 = vector.shape_cast %8 : vector<128xf32> to vector<1x128xf32>
    %cst_9 = arith.constant 1.250000e-01 : f32
    %10 = vector.broadcast %cst_9 : f32 to vector<1x128xf32>
    %11 = arith.mulf %6, %10 : vector<1x128xf32>
    %cst_10 = arith.constant 1.250000e-01 : f32
    %12 = vector.broadcast %cst_10 : f32 to vector<1x128xf32>
    %13 = arith.mulf %9, %12 : vector<1x128xf32>
    %14 = arith.mulf %11, %11 : vector<1x128xf32>
    %15 = arith.subf %13, %14 : vector<1x128xf32>
    %cst_11 = arith.constant 0.000000e+00 : f32
    %16 = vector.broadcast %cst_11 : f32 to vector<1x128xf32>
    %17 = arith.maximumf %15, %16 : vector<1x128xf32>
    %cst_12 = arith.constant 9.99999974E-6 : f32
    %18 = vector.broadcast %cst_12 : f32 to vector<1x128xf32>
    %19 = arith.addf %17, %18 : vector<1x128xf32>
    %20 = math.rsqrt %19 : vector<1x128xf32>
    %21 = arith.mulf %3, %20 : vector<1x128xf32>
    %22 = arith.mulf %11, %21 : vector<1x128xf32>
    %23 = arith.subf %4, %22 : vector<1x128xf32>
    %24 = vector.broadcast %21 : vector<1x128xf32> to vector<8x128xf32>
    %25 = arith.mulf %2, %24 : vector<8x128xf32>
    %26 = vector.broadcast %23 : vector<1x128xf32> to vector<8x128xf32>
    %27 = arith.addf %25, %26 : vector<8x128xf32>
    %cst_13 = arith.constant 0.000000e+00 : f32
    %28 = vector.broadcast %cst_13 : f32 to vector<8x128xf32>
    %29 = arith.maximumf %27, %28 : vector<8x128xf32>
    %30 = arith.truncf %29 : vector<8x128xf32> to vector<8x128xbf16>
    %c0_14 = arith.constant 0 : index
    %c0_15 = arith.constant 0 : index
    %31 = vector.load %arg4[%c0_14, %c0_15] : memref<128x128xbf16, #tpu.memory_space<vmem>>, vector<128x128xbf16>
    %cst_16 = arith.constant dense<0.000000e+00> : vector<8x128xf32>
    %32 = tpu.matmul %30, %31, %cst_16 {dimension_numbers = #tpu.dot_dimension_numbers<[1], [0], [0], [1], [0, 0, 1, 1], [], []>} : vector<8x128xbf16>, vector<128x128xbf16>, vector<8x128xf32> -> vector<8x128xf32>
    %c0_17 = arith.constant 0 : index
    %c0_18 = arith.constant 0 : index
    %33 = vector.load %arg5[%c0_17, %c0_18] : memref<1x128xf32, #tpu.memory_space<vmem>>, vector<1x128xf32>
    %c0_19 = arith.constant 0 : index
    %c0_20 = arith.constant 0 : index
    %34 = vector.load %arg6[%c0_19, %c0_20] : memref<1x128xf32, #tpu.memory_space<vmem>>, vector<1x128xf32>
    %cst_21 = arith.constant dense<0.000000e+00> : vector<128xf32>
    %35 = vector.multi_reduction <add>, %32, %cst_21 [0] : vector<8x128xf32> to vector<128xf32>
    %36 = vector.shape_cast %35 : vector<128xf32> to vector<1x128xf32>
    %37 = arith.mulf %32, %32 : vector<8x128xf32>
    %cst_22 = arith.constant dense<0.000000e+00> : vector<128xf32>
    %38 = vector.multi_reduction <add>, %37, %cst_22 [0] : vector<8x128xf32> to vector<128xf32>
    %39 = vector.shape_cast %38 : vector<128xf32> to vector<1x128xf32>
    %cst_23 = arith.constant 1.250000e-01 : f32
    %40 = vector.broadcast %cst_23 : f32 to vector<1x128xf32>
    %41 = arith.mulf %36, %40 : vector<1x128xf32>
    %cst_24 = arith.constant 1.250000e-01 : f32
    %42 = vector.broadcast %cst_24 : f32 to vector<1x128xf32>
    %43 = arith.mulf %39, %42 : vector<1x128xf32>
    %44 = arith.mulf %41, %41 : vector<1x128xf32>
    %45 = arith.subf %43, %44 : vector<1x128xf32>
    %cst_25 = arith.constant 0.000000e+00 : f32
    %46 = vector.broadcast %cst_25 : f32 to vector<1x128xf32>
    %47 = arith.maximumf %45, %46 : vector<1x128xf32>
    %cst_26 = arith.constant 9.99999974E-6 : f32
    %48 = vector.broadcast %cst_26 : f32 to vector<1x128xf32>
    %49 = arith.addf %47, %48 : vector<1x128xf32>
    %50 = math.rsqrt %49 : vector<1x128xf32>
    %51 = arith.mulf %33, %50 : vector<1x128xf32>
    %52 = arith.mulf %41, %51 : vector<1x128xf32>
    %53 = arith.subf %34, %52 : vector<1x128xf32>
    %54 = vector.broadcast %51 : vector<1x128xf32> to vector<8x128xf32>
    %55 = arith.mulf %32, %54 : vector<8x128xf32>
    %56 = vector.broadcast %53 : vector<1x128xf32> to vector<8x128xf32>
    %57 = arith.addf %55, %56 : vector<8x128xf32>
    %cst_27 = arith.constant 0.000000e+00 : f32
    %58 = vector.broadcast %cst_27 : f32 to vector<8x128xf32>
    %59 = arith.maximumf %57, %58 : vector<8x128xf32>
    %60 = arith.truncf %59 : vector<8x128xf32> to vector<8x128xbf16>
    %c0_28 = arith.constant 0 : index
    %c0_29 = arith.constant 0 : index
    %61 = vector.load %arg7[%c0_28, %c0_29] : memref<128x128xbf16, #tpu.memory_space<vmem>>, vector<128x128xbf16>
    %cst_30 = arith.constant dense<0.000000e+00> : vector<8x128xf32>
    %62 = tpu.matmul %60, %61, %cst_30 {dimension_numbers = #tpu.dot_dimension_numbers<[1], [0], [0], [1], [0, 0, 1, 1], [], []>} : vector<8x128xbf16>, vector<128x128xbf16>, vector<8x128xf32> -> vector<8x128xf32>
    %c0_31 = arith.constant 0 : index
    %c0_32 = arith.constant 0 : index
    %63 = vector.load %arg8[%c0_31, %c0_32] : memref<1x128xf32, #tpu.memory_space<vmem>>, vector<1x128xf32>
    %64 = vector.broadcast %63 : vector<1x128xf32> to vector<8x128xf32>
    %65 = arith.addf %62, %64 : vector<8x128xf32>
    %c0_33 = arith.constant 0 : index
    %c0_34 = arith.constant 0 : index
    %66 = vector.load %arg9[%c0_33, %c0_34] : memref<8x128xf32, #tpu.memory_space<vmem>>, vector<8x128xf32>
    tpu.vector_store %arg9[%c0_33, %c0_34], %65 {strides = array<i32>} : memref<8x128xf32, #tpu.memory_space<vmem>>, vector<8x128xf32>,
    return
  }
}

</mosaic_0001>

<bundles_post_ra>
// kernel: tpu_custom_call.1
= control target key start
LH: loop header
LB: loop body
LE: loop exit
PB: predicated region body
PF: predicated region fallthrough
CT: control target
= control target key end

     0   :  { %14 = vsyncpa [#allocation3], 0  ;;  %s1661_s0 = inlined_call_operand.hbm [shape: bf16[8,896], index: 0, kind: input, shape index: {}]   ;;  %s1662_s1 = inlined_call_operand.hbm [shape: bf16[896,128], index: 1, kind: input, shape index: {}]   ;;  %s1663_s2 = inlined_call_operand.vmem [shape: f32[1,128], index: 2, kind: input, shape index: {}]   ;;  %s1664_s3 = inlined_call_operand.vmem [shape: f32[1,128], index: 3, kind: input, shape index: {}]   ;;  %s1665_s4 = inlined_call_operand.hbm [shape: bf16[128,128], index: 4, kind: input, shape index: {}]   ;;  %s1666_s5 = inlined_call_operand.vmem [shape: f32[1,128], index: 5, kind: input, shape index: {}]   ;;  %s1667_s6 = inlined_call_operand.vmem [shape: f32[1,128], index: 6, kind: input, shape index: {}]   ;;  %s1668_s7 = inlined_call_operand.hbm [shape: bf16[128,128], index: 7, kind: input, shape index: {}]   ;;  %s1669_s8 = inlined_call_operand.vmem [shape: f32[1,128], index: 8, kind: input, shape index: {}]   ;;  %s1670_s9 = inlined_call_operand.hbm [shape: f32[8,128], index: 9, kind: output, shape index: {}]  }
   0x1   :  { %15 = vsyncpa [#allocation6], 0 }
   0x2   :  { %16 = vsyncpa [#allocation9], 0 }
   0x3   :  { %17 = vsyncpa [#allocation4], 0  ;;  %s1482_s30 = smov [#allocation5]   ;;  %s1364_s13 = scalar_lea.hbm %s1662_s1, 7168 }
   0x4   :  { %s33_s10 = sshll.u32 %s1482_s30, 4  ;;  %p1365_p0 = scmp.ne.s32.totalorder %s1662_s1, %s1364_s13  ;;  %s34_s10 = int_to_ptr.vmem [resolvable:$true] %s33_s10 }
   0x5   :  { %p1368_p1 = scmp.lt.u32.totalorder %s1364_s13, %s1662_s1 }
   0x7   :  { %p1370_p2 = pnand %p1368_p1, %p1365_p0 }
   0x9   :  { %1373 = shalt.err (!%p1370_p2)
}
   0xa   :  { %s1374_s18 = scalar_lea.vmem %s34_s10, 7168  ;;  %p1379_p4 = scmp.lt.s32.totalorder %s34_s10, %s34_s10 }
   0xb   :  { %p1375_p3 = scmp.ne.s32.totalorder %s34_s10, %s1374_s18  ;;  %p1380_p5 = scmp.lt.s32.totalorder %s1374_s18, %s1374_s18 }
   0xd   :  { %p1381_p6 = por %p1380_p5, %p1379_p4 }
   0xf   :  { %p1382_p7 = pnand %p1381_p6, %p1375_p3 }
  0x11   :  { %1385 = shalt.err (!%p1382_p7)
}
  0x12   :  { %s1483_s19 = smov 64   ;;  %s1484_s20 = smov 4  }
  0x13   :  { %39 = dma.hbm_to_vmem [thread:$0]  %s1662_s1, 7168, %s34_s10, [#allocation6], %s1483_s19, %s1483_s19, %s1484_s20  }
  0x14   :  { %s1485_s23 = smov [#allocation2]   ;;  %s1486_s25 = smov [#allocation7]  }
  0x15   :  { %s24_s24 = sshll.u32 %s1485_s23, 4  ;;  %s49_s26 = sshll.u32 %s1486_s25, 4  ;;  %s25_s24 = int_to_ptr.vmem [resolvable:$true] %s24_s24  ;;  %s50_s26 = int_to_ptr.vmem [resolvable:$true] %s49_s26 }
  0x16   :  { %s1386_s29 = scalar_lea.hbm %s1661_s0, 448 }
  0x17   :  { %p1387_p8 = scmp.ne.s32.totalorder %s1661_s0, %s1386_s29  ;;  %p1390_p9 = scmp.lt.u32.totalorder %s1386_s29, %s1661_s0 }
  0x19   :  { %p1392_p10 = pnand %p1390_p9, %p1387_p8 }
  0x1b   :  { %1395 = shalt.err (!%p1392_p10)
}
  0x1c   :  { %s1396_s1 = scalar_lea.vmem %s25_s24, 448  ;;  %p1401_p12 = scmp.lt.s32.totalorder %s25_s24, %s25_s24 }
  0x1d   :  { %p1397_p11 = scmp.ne.s32.totalorder %s25_s24, %s1396_s1  ;;  %p1402_p13 = scmp.lt.s32.totalorder %s1396_s1, %s1396_s1 }
  0x1f   :  { %p1403_p0 = por %p1402_p13, %p1401_p12 }
  0x21   :  { %p1404_p1 = pnand %p1403_p0, %p1397_p11 }
  0x23   :  { %1407 = shalt.err (!%p1404_p1)
}
  0x24   :  { %27 = dma.hbm_to_vmem [thread:$0]  %s1661_s0, 448, %s25_s24, [#allocation3]  }
  0x25   :  { %s1408_s17 = scalar_lea.hbm %s1665_s4, 1024 }
  0x26   :  { %p1409_p2 = scmp.ne.s32.totalorder %s1665_s4, %s1408_s17  ;;  %p1412_p3 = scmp.lt.u32.totalorder %s1408_s17, %s1665_s4 }
  0x28   :  { %p1414_p4 = pnand %p1412_p3, %p1409_p2 }
  0x2a   :  { %1417 = shalt.err (!%p1414_p4)
}
  0x2b   :  { %s1418_s25 = scalar_lea.vmem %s50_s26, 1024  ;;  %p1423_p6 = scmp.lt.s32.totalorder %s50_s26, %s50_s26 }
  0x2c   :  { %p1419_p5 = scmp.ne.s32.totalorder %s50_s26, %s1418_s25  ;;  %p1424_p7 = scmp.lt.s32.totalorder %s1418_s25, %s1418_s25 }
  0x2e   :  { %p1425_p8 = por %p1424_p7, %p1423_p6 }
  0x30   :  { %p1426_p9 = pnand %p1425_p8, %p1419_p5 }
  0x32   :  { %1429 = shalt.err (!%p1426_p9)
}
  0x33   :  { %55 = dma.hbm_to_vmem [thread:$0]  %s1665_s4, 1024, %s50_s26, [#allocation6], %s1483_s19, %s1483_s19, %s1484_s20  }
  0x34   :  { %s1487_s27 = smov [#allocation8]   ;;  %s1430_s11 = scalar_lea.hbm %s1668_s7, 1024 }
  0x35   :  { %s65_s28 = sshll.u32 %s1487_s27, 4  ;;  %p1431_p10 = scmp.ne.s32.totalorder %s1668_s7, %s1430_s11  ;;  %s66_s28 = int_to_ptr.vmem [resolvable:$true] %s65_s28 }
  0x36   :  { %p1434_p11 = scmp.lt.u32.totalorder %s1430_s11, %s1668_s7 }
  0x38   :  { %p1436_p12 = pnand %p1434_p11, %p1431_p10 }
  0x3a   :  { %1439 = shalt.err (!%p1436_p12)
}
  0x3b   :  { %s1440_s14 = scalar_lea.vmem %s66_s28, 1024  ;;  %p1445_p0 = scmp.lt.s32.totalorder %s66_s28, %s66_s28 }
  0x3c   :  { %p1441_p13 = scmp.ne.s32.totalorder %s66_s28, %s1440_s14  ;;  %p1446_p1 = scmp.lt.s32.totalorder %s1440_s14, %s1440_s14 }
  0x3e   :  { %p1447_p2 = por %p1446_p1, %p1445_p0 }
  0x40   :  { %p1448_p3 = pnand %p1447_p2, %p1441_p13 }
  0x42   :  { %1451 = shalt.err (!%p1448_p3)
}
  0x43   :  { %71 = dma.hbm_to_vmem [thread:$0]  %s1668_s7, 1024, %s66_s28, [#allocation9], %s1483_s19, %s1483_s19, %s1484_s20  }
  0x44   :  { %1474 = dma.done.wait [#allocation3], 448  }
  0x45   :  { %1475 = vsyncadd [#allocation3], 4294966848 }
  0x46   :  { %1476 = dma.done.wait [#allocation6], 8192  }
  0x47   :  { %1477 = vsyncadd [#allocation6], 4294959104 }
  0x48   :  { %1478 = dma.done.wait [#allocation9], 1024  }
  0x49   :  { %1479 = vsyncadd [#allocation9], 4294966272  ;;  %v1281_v0 = vld [vmem:[#allocation5 + $0x40] sm:$0xff]   ;;  %v1285_v4 = vld [vmem:[#allocation5 + $0x48] sm:$0xff]   ;;  %v1488_v40 = vmov 0.0   ;;  %vm1489_vm0 = vmmov 0  }
  0x4a   :  { %v1282_v1 = vld [vmem:[#allocation5 + $0xc0] sm:$0xff]   ;;  %1119 = vmatprep.subr.bf16.mxu0 %v1281_v0  ;;  %v1286_v5 = vld [vmem:[#allocation5 + $0xc8] sm:$0xff]   ;;  %v1289_v8 = vld [vmem:[#allocation5 + $0x50] sm:$0xff]  }
  0x4b   :  { %v1283_v2 = vld [vmem:[#allocation5] sm:$0xff]   ;;  %1141 = vmatprep.subr.bf16.mxu1 %v1282_v1  ;;  %v1287_v6 = vld [vmem:[#allocation5 + $0x8] sm:$0xff]   ;;  %v1290_v9 = vld [vmem:[#allocation5 + $0xd0] sm:$0xff]  }
  0x4c   :  { %v1284_v3 = vld [vmem:[#allocation5 + $0x80] sm:$0xff]   ;;  %1120 = vmatpush3.bf16.msra.mxu0 %v1283_v2  ;;  %v1288_v7 = vld [vmem:[#allocation5 + $0x88] sm:$0xff]   ;;  %v1291_v10 = vld [vmem:[#allocation5 + $0x10] sm:$0xff]  }
  0x4d   :  { %1142 = vmatpush3.bf16.msra.mxu1 %v1284_v3  ;;  %1121 = vmatprep.subr.bf16.mxu0 %v1285_v4  ;;  %v1292_v11 = vld [vmem:[#allocation5 + $0x90] sm:$0xff]   ;;  %v1293_v12 = vld [vmem:[#allocation5 + $0x58] sm:$0xff]   ;;  %v1297_v16 = vld [vmem:[#allocation5 + $0x60] sm:$0xff]  }
  0x4e   :  { %1143 = vmatprep.subr.bf16.mxu1 %v1286_v5  ;;  %v1294_v13 = vld [vmem:[#allocation5 + $0xd8] sm:$0xff]   ;;  %v1298_v17 = vld [vmem:[#allocation5 + $0xe0] sm:$0xff]   ;;  %v1301_v20 = vld [vmem:[#allocation5 + $0x68] sm:$0xff]  }
  0x4f   :  { %v1295_v14 = vld [vmem:[#allocation5 + $0x18] sm:$0xff]   ;;  %v1299_v18 = vld [vmem:[#allocation5 + $0x20] sm:$0xff]   ;;  %v1302_v21 = vld [vmem:[#allocation5 + $0xe8] sm:$0xff]  }
  0x50   :  { %1122 = vmatpush3.bf16.msra.mxu0 %v1287_v6  ;;  %v1296_v15 = vld [vmem:[#allocation5 + $0x98] sm:$0xff]   ;;  %v1300_v19 = vld [vmem:[#allocation5 + $0xa0] sm:$0xff]   ;;  %v1303_v22 = vld [vmem:[#allocation5 + $0x28] sm:$0xff]  }
  0x51   :  { %1144 = vmatpush3.bf16.msra.mxu1 %v1288_v7  ;;  %1123 = vmatprep.subr.bf16.mxu0 %v1289_v8  ;;  %v1304_v23 = vld [vmem:[#allocation5 + $0xa8] sm:$0xff]   ;;  %v1305_v24 = vld [vmem:[#allocation5 + $0x70] sm:$0xff]   ;;  %v1309_v28 = vld [vmem:[#allocation5 + $0x78] sm:$0xff]  }
  0x52   :  { %1145 = vmatprep.subr.bf16.mxu1 %v1290_v9  ;;  %v1306_v25 = vld [vmem:[#allocation5 + $0xf0] sm:$0xff]   ;;  %v1310_v29 = vld [vmem:[#allocation5 + $0xf8] sm:$0xff]   ;;  %v87_v32 = vld [vmem:[#allocation2] sm:$0xff] }
  0x53   :  { %v1307_v26 = vld [vmem:[#allocation5 + $0x30] sm:$0xff]   ;;  %v1311_v30 = vld [vmem:[#allocation5 + $0x38] sm:$0xff]   ;;  %v1039_v34 = vcombine.low %v87_v32, %v87_v32  ;;  %v1040_v35 = vcombine.high %v87_v32, %v87_v32  ;;  %v1317_v38 = vld [vmem:[#allocation5 + $0x140] sm:$0xff]  }
  0x54   :  { %1124 = vmatpush3.bf16.msra.mxu0 %v1291_v10  ;;  %v1308_v27 = vld [vmem:[#allocation5 + $0xb0] sm:$0xff]   ;;  %v1312_v31 = vld [vmem:[#allocation5 + $0xb8] sm:$0xff]   ;;  %v1318_v39 = vld [vmem:[#allocation5 + $0x100] sm:$0xff]  }
  0x55   :  { %1146 = vmatpush3.bf16.msra.mxu1 %v1292_v11  ;;  %1125 = vmatprep.subr.bf16.mxu0 %v1293_v12  ;;  %v88_v33 = vld [vmem:[#allocation2 + $0x8] sm:$0xff]  ;;  %v1319_v41 = vld [vmem:[#allocation5 + $0x180] sm:$0xff]   ;;  %v1326_v48 = vld [vmem:[#allocation5 + $0x158] sm:$0xff]  }
  0x56   :  { %1147 = vmatprep.subr.bf16.mxu1 %v1294_v13  ;;  %v1041_v36 = vcombine.low %v88_v33, %v88_v33  ;;  %v1042_v37 = vcombine.high %v88_v33, %v88_v33  ;;  %596 = vmatprep.mubr.bf16.mxu0 %v1040_v35  ;;  %v1320_v42 = vld [vmem:[#allocation5 + $0x148] sm:$0xff]   ;;  %v1323_v45 = vld [vmem:[#allocation5 + $0x150] sm:$0xff]   ;;  %v1328_v49 = vld [vmem:[#allocation5 + $0x198] sm:$0xff]  }
  0x57   :  { %v1321_v43 = vld [vmem:[#allocation5 + $0x108] sm:$0xff]   ;;  %v1325_v46 = vld [vmem:[#allocation5 + $0x190] sm:$0xff]   ;;  %v1327_v50 = vld [vmem:[#allocation5 + $0x118] sm:$0xff]  }
  0x58   :  { %1126 = vmatpush3.bf16.msra.mxu0 %v1295_v14  ;;  %636 = vmatprep.mubr.bf16.mxu1 %v1042_v37  ;;  %v1322_v44 = vld [vmem:[#allocation5 + $0x188] sm:$0xff]   ;;  %v1324_v47 = vld [vmem:[#allocation5 + $0x110] sm:$0xff]   ;;  %v1329_v51 = vld [vmem:[#allocation5 + $0x160] sm:$0xff]  }
  0x59   :  { %1148 = vmatpush3.bf16.msra.mxu1 %v1296_v15  ;;  %1127 = vmatprep.subr.bf16.mxu0 %v1297_v16  ;;  %v1331_v52 = vld [vmem:[#allocation5 + $0x1a0] sm:$0xff]   ;;  %v1332_v54 = vld [vmem:[#allocation5 + $0x168] sm:$0xff]   ;;  %v1335_v57 = vld [vmem:[#allocation5 + $0x170] sm:$0xff]  }
  0x5a   :  { %1149 = vmatprep.subr.bf16.mxu1 %v1298_v17  ;;  %v1330_v53 = vld [vmem:[#allocation5 + $0x120] sm:$0xff]   ;;  %v1334_v55 = vld [vmem:[#allocation5 + $0x1a8] sm:$0xff]   ;;  %v89_v58 = vld [vmem:[#allocation2 + $0x10] sm:$0xff] }
  0x5b   :  { %v1333_v56 = vld [vmem:[#allocation5 + $0x128] sm:$0xff]   ;;  %v1336_v59 = vld [vmem:[#allocation5 + $0x130] sm:$0xff]   ;;  %v1044_v61 = vcombine.high %v89_v58, %v89_v58  ;;  %v1338_v62 = vld [vmem:[#allocation5 + $0x178] sm:$0xff]   ;;  %v1043_v2 = vcombine.low %v89_v58, %v89_v58 }
  0x5c   :  { %1128 = vmatpush3.bf16.msra.mxu0 %v1299_v18  ;;  %v1337_v60 = vld [vmem:[#allocation5 + $0x1b0] sm:$0xff]   ;;  %v1342_v63 = vld [vmem:[#allocation5 + $0x1b8] sm:$0xff]   ;;  %v1344_v3 = vld [vmem:[#allocation7] sm:$0xff]  }
  0x5d   :  { %1150 = vmatpush3.bf16.msra.mxu1 %v1300_v19  ;;  %1129 = vmatprep.subr.bf16.mxu0 %v1301_v20  ;;  %v1339_v0 = vld [vmem:[#allocation5 + $0x138] sm:$0xff]   ;;  %v1345_v4 = vld [vmem:[#allocation7 + $0x8] sm:$0xff]   ;;  %v1346_v5 = vld [vmem:[#allocation7 + $0x10] sm:$0xff]  }
  0x5e   :  { %1151 = vmatprep.subr.bf16.mxu1 %v1302_v21  ;;  %v1343_v1 = vld [vmem:[#allocation2 + $0x18] ss:$0 sps:$4 sm:$0xff]   ;;  %v1348_v7 = vld [vmem:[#allocation7 + $0x20] sm:$0xff]   ;;  %v1349_v8 = vld [vmem:[#allocation7 + $0x28] sm:$0xff]  }
  0x5f   :  { %v1347_v6 = vld [vmem:[#allocation7 + $0x18] sm:$0xff]   ;;  %v1350_v9 = vld [vmem:[#allocation7 + $0x30] sm:$0xff]  }
  0x60   :  { %1130 = vmatpush3.bf16.msra.mxu0 %v1303_v22  ;;  %v1351_v10 = vld [vmem:[#allocation7 + $0x38] sm:$0xff]  }
  0x61   :  { %1152 = vmatpush3.bf16.msra.mxu1 %v1304_v23  ;;  %1131 = vmatprep.subr.bf16.mxu0 %v1305_v24 }
  0x62   :  { %1153 = vmatprep.subr.bf16.mxu1 %v1306_v25 }
  0x64   :  { %1132 = vmatpush3.bf16.msra.mxu0 %v1307_v26 }
  0x65   :  { %1154 = vmatpush3.bf16.msra.mxu1 %v1308_v27  ;;  %1133 = vmatprep.subr.bf16.mxu0 %v1309_v28 }
  0x66   :  { %1155 = vmatprep.subr.bf16.mxu1 %v1310_v29 }
  0x68   :  { %1134 = vmatpush3.bf16.msra.mxu0 %v1311_v30 }
  0x69   :  { %1156 = vmatpush3.bf16.msra.mxu1 %v1312_v31  ;;  %1163 = vmatprep.subr.bf16.mxu0 %v1317_v38 }
  0x6a   :  { %1212 = vmatprep.subr.bf16.mxu1 %v1488_v40 }
  0x6b   :  { %597 = vmatmul.mubr.bf16.vlgmr.msra.gmra.mrb[0].mxu0 %v1039_v34 }
  0x6c   :  { %637 = vmatmul.mubr.bf16.vlgmr.msra.gmra.mrb[0].mxu1 %v1041_v36  ;;  %1164 = vmatpush3.bf16.msra.mxu0 %v1318_v39 }
  0x6d   :  { %1213 = vmatpush3.bf16.msra.mxu1 %v1319_v41  ;;  %1165 = vmatprep.subr.bf16.mxu0 %v1320_v42 }
  0x6e   :  { %1214 = vmatprep.subr.bf16.mxu1 %v1488_v40  ;;  %1228 = vmatprep.mubr.msk.bf16.mxu1 %vm1489_vm0, %v1488_v40 }
  0x6f   :  { %676 = vmatprep.mubr.bf16.mxu0 %v1044_v61 }
  0x70   :  { %1166 = vmatpush3.bf16.msra.mxu0 %v1321_v43 }
  0x71   :  { %1215 = vmatpush3.bf16.msra.mxu1 %v1322_v44  ;;  %1167 = vmatprep.subr.bf16.mxu0 %v1323_v45 }
  0x72   :  { %1216 = vmatprep.subr.bf16.mxu1 %v1488_v40 }
  0x74   :  { %1168 = vmatpush3.bf16.msra.mxu0 %v1324_v47 }
  0x75   :  { %1217 = vmatpush3.bf16.msra.mxu1 %v1325_v46  ;;  %1169 = vmatprep.subr.bf16.mxu0 %v1326_v48 }
  0x76   :  { %1218 = vmatprep.subr.bf16.mxu1 %v1488_v40 }
  0x78   :  { %1170 = vmatpush3.bf16.msra.mxu0 %v1327_v50 }
  0x79   :  { %1219 = vmatpush3.bf16.msra.mxu1 %v1328_v49  ;;  %1171 = vmatprep.subr.bf16.mxu0 %v1329_v51 }
  0x7a   :  { %1220 = vmatprep.subr.bf16.mxu1 %v1488_v40 }
  0x7c   :  { %1172 = vmatpush3.bf16.msra.mxu0 %v1330_v53  ;;  %v750_v53 = vlaneseq }
  0x7d   :  { %1221 = vmatpush3.bf16.msra.mxu1 %v1331_v52  ;;  %1173 = vmatprep.subr.bf16.mxu0 %v1332_v54 }
  0x7e   :  { %1222 = vmatprep.subr.bf16.mxu1 %v1488_v40  ;;  %v751_v54 = vshrl.u32 %v750_v53, 7 }
  0x80   :  { %1174 = vmatpush3.bf16.msra.mxu0 %v1333_v56  ;;  %v1624_v56 = vsub.s32 0, %v751_v54 }
  0x81   :  { %1223 = vmatpush3.bf16.msra.mxu1 %v1334_v55  ;;  %1175 = vmatprep.subr.bf16.mxu0 %v1335_v57  ;;  %v724_v55 = vld [vmem:[%s1663_s2] sm:$0x1] }
  0x82   :  { %1224 = vmatprep.subr.bf16.mxu1 %v1488_v40 }
  0x84   :  { %1176 = vmatpush3.bf16.msra.mxu0 %v1336_v59  ;;  %v725_v59 = vld [vmem:[%s1664_s3] sm:$0x1] }
  0x85   :  { %1225 = vmatpush3.bf16.msra.mxu1 %v1337_v60  ;;  %1177 = vmatprep.subr.bf16.mxu0 %v1338_v62 }
  0x86   :  { %1226 = vmatprep.subr.bf16.mxu1 %v1488_v40 }
  0x88   :  { %1178 = vmatpush3.bf16.msra.mxu0 %v1339_v0 }
  0x89   :  { %1227 = vmatpush3.bf16.msra.mxu1 %v1342_v63  ;;  %1232 = vmatprep.subr.bf16.mxu0 %v1488_v40 }
  0x8a   :  { %1252 = vmatprep.subr.bf16.mxu1 %v1488_v40 }
  0x8b   :  { %677 = vmatmul.mubr.bf16.vlgmr.msra.gmra.mrb[4].mxu0 %v1043_v2 }
  0x8c   :  { %1229 = vmatmul.mubr.bf16.vlgmr.msra.gmra.mrb[4].mxu1 %v1343_v1  ;;  %1248 = vmatprep.mubr.msk.bf16.mxu0 %vm1489_vm0, %v1488_v40 }
  0x8d   :  { %1268 = vmatprep.mubr.msk.bf16.mxu1 %vm1489_vm0, %v1488_v40  ;;  %1233 = vmatpush3.bf16.msra.mxu0 %v1344_v3 }
  0x8e   :  { %1234 = vmatprep.subr.bf16.mxu0 %v1488_v40 }
  0x91   :  { %1235 = vmatpush3.bf16.msra.mxu0 %v1345_v4  ;;  %v1352_v4 = vld [vmem:[#allocation8] sm:$0xff]  }
  0x92   :  { %1236 = vmatprep.subr.bf16.mxu0 %v1488_v40  ;;  %1253 = vmatpush3.bf16.msra.mxu1 %v1352_v4 }
  0x93   :  { %1254 = vmatprep.subr.bf16.mxu1 %v1488_v40 }
  0x95   :  { %1237 = vmatpush3.bf16.msra.mxu0 %v1346_v5  ;;  %v1353_v5 = vld [vmem:[#allocation8 + $0x8] sm:$0xff]  }
  0x96   :  { %1238 = vmatprep.subr.bf16.mxu0 %v1488_v40  ;;  %1255 = vmatpush3.bf16.msra.mxu1 %v1353_v5 }
  0x97   :  { %1256 = vmatprep.subr.bf16.mxu1 %v1488_v40 }
  0x99   :  { %1239 = vmatpush3.bf16.msra.mxu0 %v1347_v6  ;;  %v1354_v6 = vld [vmem:[#allocation8 + $0x10] sm:$0xff]  }
  0x9a   :  { %1240 = vmatprep.subr.bf16.mxu0 %v1488_v40  ;;  %1257 = vmatpush3.bf16.msra.mxu1 %v1354_v6 }
  0x9b   :  { %1258 = vmatprep.subr.bf16.mxu1 %v1488_v40 }
  0x9d   :  { %1241 = vmatpush3.bf16.msra.mxu0 %v1348_v7  ;;  %v1355_v7 = vld [vmem:[#allocation8 + $0x18] sm:$0xff]  }
  0x9e   :  { %1242 = vmatprep.subr.bf16.mxu0 %v1488_v40  ;;  %1259 = vmatpush3.bf16.msra.mxu1 %v1355_v7 }
  0x9f   :  { %1260 = vmatprep.subr.bf16.mxu1 %v1488_v40 }
  0xa1   :  { %1243 = vmatpush3.bf16.msra.mxu0 %v1349_v8  ;;  %v1356_v8 = vld [vmem:[#allocation8 + $0x20] sm:$0xff]  }
  0xa2   :  { %1244 = vmatprep.subr.bf16.mxu0 %v1488_v40  ;;  %1261 = vmatpush3.bf16.msra.mxu1 %v1356_v8 }
  0xa3   :  { %1262 = vmatprep.subr.bf16.mxu1 %v1488_v40 }
  0xa5   :  { %1245 = vmatpush3.bf16.msra.mxu0 %v1350_v9  ;;  %v1357_v9 = vld [vmem:[#allocation8 + $0x28] sm:$0xff]  }
  0xa6   :  { %1246 = vmatprep.subr.bf16.mxu0 %v1488_v40  ;;  %1263 = vmatpush3.bf16.msra.mxu1 %v1357_v9 }
  0xa7   :  { %1264 = vmatprep.subr.bf16.mxu1 %v1488_v40 }
  0xa9   :  { %1247 = vmatpush3.bf16.msra.mxu0 %v1351_v10  ;;  %v1358_v10 = vld [vmem:[#allocation8 + $0x30] sm:$0xff]  }
  0xaa   :  { %1265 = vmatpush3.bf16.msra.mxu1 %v1358_v10 }
  0xab   :  { %1266 = vmatprep.subr.bf16.mxu1 %v1488_v40 }
 0x13e   :  { %v1135_v11 = vpop.f32.mrb[0].mxu0 }
 0x13f   :  { %v1157_v12 = vpop.f32.mrb[0].mxu1  ;;  %v1136_v13 = vpop.f32.mrb[1].mxu0 }
 0x140   :  { %v1158_v14 = vpop.f32.mrb[1].mxu1  ;;  %v1137_v15 = vadd.f32 %v1136_v13, %v1135_v11  ;;  %v1138_v17 = vpop.f32.mrb[2].mxu0  ;;  %v1359_v11 = vld [vmem:[#allocation8 + $0x38] sm:$0xff]  }
 0x141   :  { %v1159_v16 = vadd.f32 %v1158_v14, %v1157_v12  ;;  %v1160_v18 = vpop.f32.mrb[2].mxu1  ;;  %v1139_v19 = vpop.f32.mrb[3].mxu0  ;;  %1267 = vmatpush3.bf16.msra.mxu1 %v1359_v11 }
 0x142   :  { %v1161_v20 = vpop.f32.mrb[3].mxu1 }
 0x143   :  { %v639_v21 = vadd.f32 %v1159_v16, %v1137_v15 }
 0x15e   :  { %v1179_v23 = vpop.f32.mrb[4].mxu0 }
 0x15f   :  { %v718_v22 = vpop.f32.mrb[4].mxu1  ;;  %v1180_v25 = vpop.f32.mrb[5].mxu0 }
 0x160   :  { %v1230_v24 = vpop.f32.mrb[5].mxu1  ;;  %v1181_v27 = vadd.f32 %v1180_v25, %v1179_v23  ;;  %v1182_v28 = vpop.f32.mrb[6].mxu0 }
 0x161   :  { %v721_v26 = vpop.f32.mrb[6].mxu1  ;;  %v1183_v30 = vpop.f32.mrb[7].mxu0 }
 0x162   :  { %v1231_v29 = vpop.f32.mrb[7].mxu1  ;;  %v679_v31 = vadd.f32 %v1181_v27, %v639_v21 }
 0x164   :  { %v719_v32 = vadd.f32 %v718_v22, %v679_v31 }
 0x166   :  { %v726_v33 = vrot.slane %v719_v32, 4  ;;  %v732_v34 = vmul.f32 %v719_v32, %v719_v32 }
 0x168   :  { %v727_v35 = vadd.f32 %v726_v33, %v719_v32  ;;  %v733_v36 = vrot.slane %v732_v34, 4 }
 0x16a   :  { %v728_v37 = vrot.slane %v727_v35, 2  ;;  %v734_v38 = vadd.f32 %v733_v36, %v732_v34  ;;  %v869_v34 = vld [vmem:[%s1666_s5] sm:$0x1]  ;;  %s1490_s5 = smov [#allocation10]  }
 0x16b   :  { %s1028_s22 = sshll.u32 %s1490_s5, 4  ;;  %s1029_s22 = int_to_ptr.vmem [resolvable:$true] %s1028_s22 }
 0x16c   :  { %v729_v39 = vadd.f32 %v728_v37, %v727_v35  ;;  %v735_v41 = vrot.slane %v734_v38, 2  ;;  %v870_v37 = vld [vmem:[%s1667_s6] sm:$0x1]  ;;  %s1452_s6 = scalar_lea.vmem %s1029_s22, 128  ;;  %p1457_p5 = scmp.lt.s32.totalorder %s1029_s22, %s1029_s22 }
 0x16d   :  { %p1453_p4 = scmp.ne.s32.totalorder %s1029_s22, %s1452_s6  ;;  %p1458_p6 = scmp.lt.s32.totalorder %s1452_s6, %s1452_s6 }
 0x16e   :  { %v730_v42 = vrot.slane %v729_v39, 1  ;;  %v736_v43 = vadd.f32 %v735_v41, %v734_v38 }
 0x16f   :  { %p1459_p7 = por %p1458_p6, %p1457_p5 }
 0x170   :  { %v731_v44 = vadd.f32 %v730_v42, %v729_v39  ;;  %v737_v45 = vrot.slane %v736_v43, 1 }
 0x171   :  { %p1460_p8 = pnand %p1459_p7, %p1453_p4 }
 0x172   :  { %v738_v46 = vadd.f32 %v737_v45, %v736_v43  ;;  %v739_v47 = vmul.f32 0.125, %v731_v44 }
 0x174   :  { %v740_v48 = vmul.f32 0.125, %v738_v46  ;;  %v741_v49 = vmul.f32 %v739_v47, %v739_v47 }
 0x176   :  { %v742_v50 = vsub.f32 %v740_v48, %v741_v49 }
 0x178   :  { %v743_v51 = vmax.f32 %v742_v50, 0.0 }
 0x17a   :  { %v744_v52 = vadd.f32 1e-05, %v743_v51 }
 0x17c   :  { %1360 = vrsqrt.f32 %v744_v52 }
 0x186   :  { %v1361_v57 = vpop.eup %1360 }
 0x187   :  { %v746_v58 = vmul.f32 %v1361_v57, %v724_v55 }
 0x189   :  { %v753_v60 = vrot.slane %v746_v58, %v1624_v56  ;;  %v747_v61 = vmul.f32 %v746_v58, %v739_v47  ;;  %v1110_v47 = vld [vmem:[%s1669_s8] ss:$0 sm:$0xff] }
 0x18b   :  { %v748_v62 = vsub.f32 %v725_v59, %v747_v61  ;;  %v755_v63 = vmul.f32 %v753_v60, %v719_v32 }
 0x18d   :  { %v760_v0 = vrot.slane %v748_v62, %v1624_v56 }
 0x18f   :  { %v762_v1 = vadd.f32 %v760_v0, %v755_v63 }
 0x191   :  { %v763_v2 = vmax.f32 %v762_v1, 0.0 }
 0x193   :  { %v764_v3 = vpack.c.bf16 %v763_v2, %v763_v2 }
 0x195   :  { %1249 = vmatmul.mubr.bf16.vlgmr.msra.gmra.mrb[8].mxu0 %v764_v3 }
 0x268   :  { %v863_v12 = vpop.f32.mrb[8].mxu0 }
 0x269   :  { %v871_v13 = vrot.slane %v863_v12, 4  ;;  %v877_v14 = vmul.f32 %v863_v12, %v863_v12  ;;  %v1250_v15 = vpop.f32.mrb[9].mxu0 }
 0x26a   :  { %v866_v16 = vpop.f32.mrb[10].mxu0 }
 0x26b   :  { %v872_v17 = vadd.f32 %v871_v13, %v863_v12  ;;  %v878_v18 = vrot.slane %v877_v14, 4  ;;  %v1251_v19 = vpop.f32.mrb[11].mxu0 }
 0x26d   :  { %v873_v20 = vrot.slane %v872_v17, 2  ;;  %v879_v21 = vadd.f32 %v878_v18, %v877_v14 }
 0x26f   :  { %v874_v22 = vadd.f32 %v873_v20, %v872_v17  ;;  %v880_v23 = vrot.slane %v879_v21, 2 }
 0x271   :  { %v875_v24 = vrot.slane %v874_v22, 1  ;;  %v881_v25 = vadd.f32 %v880_v23, %v879_v21 }
 0x273   :  { %v876_v26 = vadd.f32 %v875_v24, %v874_v22  ;;  %v882_v27 = vrot.slane %v881_v25, 1 }
 0x275   :  { %v883_v28 = vadd.f32 %v882_v27, %v881_v25  ;;  %v884_v40 = vmul.f32 0.125, %v876_v26 }
 0x277   :  { %v885_v29 = vmul.f32 0.125, %v883_v28  ;;  %v886_v30 = vmul.f32 %v884_v40, %v884_v40 }
 0x279   :  { %v887_v31 = vsub.f32 %v885_v29, %v886_v30 }
 0x27b   :  { %v888_v32 = vmax.f32 %v887_v31, 0.0 }
 0x27d   :  { %v889_v33 = vadd.f32 1e-05, %v888_v32 }
 0x27f   :  { %1362 = vrsqrt.f32 %v889_v33 }
 0x289   :  { %v1363_v35 = vpop.eup %1362 }
 0x28a   :  { %v891_v36 = vmul.f32 %v1363_v35, %v869_v34 }
 0x28c   :  { %v892_v38 = vmul.f32 %v891_v36, %v884_v40  ;;  %v898_v39 = vrot.slane %v891_v36, %v1624_v56 }
 0x28e   :  { %v893_v41 = vsub.f32 %v870_v37, %v892_v38  ;;  %v900_v42 = vmul.f32 %v898_v39, %v863_v12 }
 0x290   :  { %v905_v43 = vrot.slane %v893_v41, %v1624_v56 }
 0x292   :  { %v907_v44 = vadd.f32 %v905_v43, %v900_v42 }
 0x294   :  { %v908_v45 = vmax.f32 %v907_v44, 0.0 }
 0x296   :  { %v909_v46 = vpack.c.bf16 %v908_v45, %v908_v45 }
 0x298   :  { %1269 = vmatmul.mubr.bf16.vlgmr.msra.gmra.mrb[8].mxu1 %v909_v46 }
 0x36b   :  { %v1015_v48 = vpop.f32.mrb[8].mxu1 }
 0x36c   :  { %v1016_v49 = vadd.f32 %v1110_v47, %v1015_v48  ;;  %v1270_v50 = vpop.f32.mrb[9].mxu1 }
 0x36d   :  { %v1018_v51 = vpop.f32.mrb[10].mxu1 }
 0x36e   :  { %1021 = vst [vmem:[#allocation10] sm:$0xff] %v1016_v49  ;;  %v1271_v52 = vpop.f32.mrb[11].mxu1 }
 0x36f   :  { %1463 = shalt.err (!%p1460_p8)
}
 0x370   :  { %s1464_s8 = scalar_lea.hbm %s1670_s9, 128 }
 0x371   :  { %p1465_p9 = scmp.ne.s32.totalorder %s1670_s9, %s1464_s8  ;;  %p1468_p10 = scmp.lt.u32.totalorder %s1464_s8, %s1670_s9 }
 0x373   :  { %p1470_p11 = pnand %p1468_p10, %p1465_p9 }
 0x375   :  { %1473 = shalt.err (!%p1470_p11)
}
 0x376   :  { %1031 = dma.vmem_to_hbm [thread:$0]  %s1029_s22, 128, %s1670_s9, [#allocation4]  }
 0x377   :  { %1480 = dma.done.wait [#allocation4], 128  }
 0x378   :  { %1481 = vsyncadd [#allocation4], 4294967168 }
 0x379   :  { %1035 = vsyncpa [#allocation3], 1 }
 0x37a   :  { %1036 = vsyncpa [#allocation6], 1 }
 0x37b   :  { %1037 = vsyncpa [#allocation9], 1 }
 0x37c   :  { %1038 = vsyncpa [#allocation4], 1 }

</bundles_post_ra>
